<compile_context>
chip_gen: v5e
topology: v5e:2x2
jax: 0.10.0
libtpu: 0.0.40
codegen_flags: <defaults>
</compile_context>

<pallas_src>
import numpy as np
import jax
import jax.numpy as jnp
from jax.experimental import pallas as pl
from jax.experimental.pallas import tpu as pltpu


def _round_up(x, m):
    return ((x + m - 1) // m) * m


def _small_vmem():
    # v7x TensorCores have 64 MiB VMEM; v5e/v5p/v6e have 128 MiB.
    # Be conservative for unknown device kinds.
    try:
        kind = jax.devices()[0].device_kind.lower()
    except Exception:
        return True
    return not any(tag in kind for tag in ("v5", "v6"))


# ----------------------------- Pallas kernel ------------------------------ #
def _stft_matmul_kernel(frames_ref, w_ref, out_ref):
    # bf16 frames x bf16 fused (window*DFT) weights -> f32 MXU accumulation.
    # One dot produces both the real and imag columns (they are just different
    # columns of the fused weight matrix) in a single lane-dense store.
    out_ref[...] = jnp.dot(frames_ref[...], w_ref[...],
                           preferred_element_type=jnp.float32)


def _select_tiles(M, k_pad, w_pad, small_vmem):
    """Pick (tile_m, tile_n, vmem_limit_bytes) under a per-generation budget."""
    budget = (36 if small_vmem else 80) * 1024 * 1024
    tile_m = 512 if small_vmem else 1024
    # Don't over-pad tiny problems.
    tile_m = min(tile_m, max(256, _round_up(M, 256)))

    # tile_n candidates: divisors of w_pad that are multiples of 256, big first.
    cand_n = [d for d in range(w_pad, 255, -256) if w_pad % d == 0] or [w_pad]

    def need(tm, tn):
        # (potentially) double-buffered weights + double-buffered frames/out.
        return 2 * k_pad * tn * 2 + 2 * tm * k_pad * 2 + 2 * tm * tn * 4

    # Prefer fully-resident weights (tile_n == w_pad); shrink only if they
    # would eat more than half the budget (e.g. n_fft >= 4096 on v7x).
    tile_n = next((tn for tn in cand_n if 2 * k_pad * tn * 2 <= budget // 2),
                  cand_n[-1])
    while need(tile_m, tile_n) > budget and tile_m > 256:
        tile_m //= 2

    vmem_limit = min(need(tile_m, tile_n) + 16 * 1024 * 1024,
                     (56 if small_vmem else 100) * 1024 * 1024)
    return tile_m, tile_n, int(vmem_limit)


def _stft_matmul(frames, w, *, tile_m, tile_n, vmem_limit):
    """frames (M_pad, K_pad) bf16, w (K_pad, W_pad) bf16 -> (M_pad, W_pad) f32."""
    M_pad, K_pad = frames.shape
    K2, W_pad = w.shape
    assert K_pad == K2
    assert M_pad % tile_m == 0 and W_pad % tile_n == 0 and K_pad % 128 == 0

    m_tiles = M_pad // tile_m
    n_tiles = W_pad // tile_n

    cost = pl.CostEstimate(
        flops=2 * M_pad * K_pad * W_pad,
        transcendentals=0,
        bytes_accessed=(frames.size * 2
                        + w.size * 2 * (m_tiles if n_tiles > 1 else 1)
                        + M_pad * W_pad * 4),
    )

    return pl.pallas_call(
        _stft_matmul_kernel,
        out_shape=jax.ShapeDtypeStruct((M_pad, W_pad), jnp.float32),
        # m is the outer (megacore-sharded) axis with many even tiles; the
        # inner n axis has a single tile in the common case, so the weight
        # block index never changes and the weights stay VMEM-resident while
        # the frames stream through exactly once.
        grid=(m_tiles, n_tiles),
        in_specs=[
            pl.BlockSpec((tile_m, K_pad), lambda m, n: (m, 0)),
            pl.BlockSpec((K_pad, tile_n), lambda m, n: (0, n)),
        ],
        out_specs=pl.BlockSpec((tile_m, tile_n), lambda m, n: (m, n)),
        compiler_params=pltpu.CompilerParams(
            dimension_semantics=("parallel", "arbitrary"),
            vmem_limit_bytes=vmem_limit,
        ),
        cost_estimate=cost,
    )(frames, w)


# ------------------------------ glue / setup ------------------------------ #
def _make_window_np(win_length, window):
    n = np.arange(win_length, dtype=np.float64)
    c = 2.0 * np.pi * n / win_length  # torch windows are periodic by default
    if window == "hann":
        return 0.5 - 0.5 * np.cos(c)
    if window == "hamming":
        return 0.54 - 0.46 * np.cos(c)
    if window == "blackman":
        return 0.42 - 0.5 * np.cos(c) + 0.08 * np.cos(2.0 * c)
    raise ValueError(window)


def _make_fused_weights(n_fft, win_length, window, k_pad):
    """Fused (window * DFT) matrix, built in float64 on host, cast to bf16.

    Column layout ("Nyquist free-slot" packing):
      [0, freq_bins)                  -> real part of bins 0 .. freq_bins-1
      [freq_bins, freq_bins + n_imag) -> imag part of bins 1 .. n_imag
    For even n_fft the imag parts of bin 0 and the Nyquist bin are identically
    zero, so n_imag = freq_bins - 2 and the used width is exactly n_fft (a
    multiple of 256 for power-of-two n_fft >= 256) -> zero wasted MXU columns.
    Rows >= n_fft and columns >= the used width are zero padding.
    """
    win = _make_window_np(win_length, window)
    if win_length < n_fft:  # torch.stft center-pads the window to n_fft
        left = (n_fft - win_length) // 2
        win = np.pad(win, (left, n_fft - win_length - left))

    freq_bins = n_fft // 2 + 1
    n_imag = freq_bins - 2 if n_fft % 2 == 0 else freq_bins - 1
    w_pad = max(256, _round_up(freq_bins + n_imag, 256))

    n = np.arange(n_fft, dtype=np.int64)[:, None]
    f_re = np.arange(freq_bins, dtype=np.int64)[None, :]
    f_im = np.arange(1, 1 + n_imag, dtype=np.int64)[None, :]
    # Exact modular reduction of n*f before cos/sin -> no large-argument error.
    ang_re = 2.0 * np.pi * ((n * f_re) % n_fft).astype(np.float64) / n_fft
    ang_im = 2.0 * np.pi * ((n * f_im) % n_fft).astype(np.float64) / n_fft

    w = np.zeros((k_pad, w_pad), dtype=np.float64)
    w[:n_fft, :freq_bins] = win[:, None] * np.cos(ang_re)
    w[:n_fft, freq_bins:freq_bins + n_imag] = -win[:, None] * np.sin(ang_im)
    return jnp.asarray(w, dtype=jnp.bfloat16), n_imag, w_pad


def stft_forward(
    x,
    n_fft=2048,
    hop_length=None,
    win_length=None,
    window="hann",
    center=True,
    pad_mode="reflect",
):
    """Matches STFT.forward: returns (real, imag), each (B, C, T, freq_bins)."""
    assert pad_mode in ("constant", "reflect")
    if win_length is None:
        win_length = n_fft
    if hop_length is None:
        hop_length = int(win_length // 4)
    assert hop_length > 0

    x = jnp.asarray(x, dtype=jnp.float32)
    assert x.ndim == 3
    B, C, L = x.shape
    freq_bins = n_fft // 2 + 1
    k_pad = _round_up(n_fft, 128)

    w, n_imag, w_pad = _make_fused_weights(n_fft, win_length, window, k_pad)

    if center:
        pad = n_fft // 2
        if pad_mode == "reflect" and L <= pad:
            raise ValueError("reflect padding requires data_length > n_fft // 2")
        x = jnp.pad(x, ((0, 0), (0, 0), (pad, pad)),
                    mode="reflect" if pad_mode == "reflect" else "constant")
    L_pad = x.shape[-1]
    if L_pad < n_fft:
        raise ValueError("data_length too short for n_fft (with center=False)")
    T = 1 + (L_pad - n_fft) // hop_length

    # ---- frame extraction (pure data movement; stays in JAX) ----
    x = x.astype(jnp.bfloat16)  # half the HBM traffic for the frames array
    if n_fft % hop_length == 0:
        # Hop-chunk reshape + static slices: frame t = chunks[t : t+n_chunks]
        # concatenated.  Slice-based extraction runs at DMA speed (no gather).
        n_chunks = n_fft // hop_length
        rows = T + n_chunks - 1
        chunks = x[:, :, : rows * hop_length].reshape(B, C, rows, hop_length)
        frames = jnp.concatenate(
            [chunks[:, :, j:j + T, :] for j in range(n_chunks)], axis=-1)
    else:
        # Rare fallback (hop does not divide n_fft): overlapping gather.
        idx = (jnp.arange(T) * hop_length)[:, None] + jnp.arange(n_fft)[None, :]
        frames = x[:, :, idx]
    frames = frames.reshape(B * C * T, n_fft)

    M = B * C * T
    tile_m, tile_n, vmem_limit = _select_tiles(M, k_pad, w_pad, _small_vmem())
    m_pad = _round_up(M, tile_m)
    frames = jnp.pad(frames, ((0, m_pad - M), (0, k_pad - n_fft)))

    out = _stft_matmul(frames, w, tile_m=tile_m, tile_n=tile_n,
                       vmem_limit=vmem_limit)

    # Real output is a contiguous slice (Nyquist real column is col freq_bins-1).
    real = out[:M, :freq_bins].reshape(B, C, T, freq_bins)
    # Imag output: bin 0 is identically zero; bins 1..n_imag come from the
    # packed columns; for even n_fft the Nyquist imag bin is also zero.
    zero = jnp.zeros((M, 1), out.dtype)
    parts = [zero, out[:M, freq_bins:freq_bins + n_imag]]
    if n_fft % 2 == 0:
        parts.append(zero)
    imag = jnp.concatenate(parts, axis=-1).reshape(B, C, T, freq_bins)
    return real, imag


# --------------------------------- main ----------------------------------- #
if __name__ == "__main__":
    key = jax.random.PRNGKey(0)
    B, C, L = 2, 2, 1024
    n_fft = 256            # small; hop = n_fft // 4 = 64
    x = jax.random.normal(key, (B, C, L), dtype=jnp.float32)

    real, imag = stft_forward(x, n_fft=n_fft)
    jax.block_until_ready((real, imag))

    hop = n_fft // 4
    T = 1 + L // hop       # center=True -> padded length = L + n_fft
    freq_bins = n_fft // 2 + 1
    assert real.shape == (B, C, T, freq_bins), real.shape
    assert imag.shape == (B, C, T, freq_bins), imag.shape

    # Numerical sanity check against jnp.fft.rfft of the f32 windowed frames.
    # Tolerances account for the bf16 MXU path (f32 accumulation).
    win = 0.5 - 0.5 * jnp.cos(2.0 * jnp.pi * jnp.arange(n_fft) / n_fft)
    xp = jnp.pad(x, ((0, 0), (0, 0), (n_fft // 2, n_fft // 2)), mode="reflect")
    idx = (jnp.arange(T) * hop)[:, None] + jnp.arange(n_fft)[None, :]
    ref_frames = xp[:, :, idx] * win
    ref = jnp.fft.rfft(ref_frames.astype(jnp.float32), axis=-1)
    assert np.allclose(np.asarray(real), np.asarray(ref.real), atol=1e-1, rtol=1e-2)
    assert np.allclose(np.asarray(imag), np.asarray(ref.imag), atol=1e-1, rtol=1e-2)

    print("KERNEL_OK")
</pallas_src>

<mosaic_0001>
module attributes {stable_mosaic.version = 11 : i64} {
  func.func @_stft_matmul_kernel(%arg0: i32, %arg1: i32, %arg2: memref<256x256xbf16, #tpu.memory_space<vmem>>, %arg3: memref<256x256xbf16, #tpu.memory_space<vmem>>, %arg4: memref<256x256xf32, #tpu.memory_space<vmem>>) attributes {dimension_semantics = [#tpu.dimension_semantics<parallel>, #tpu.dimension_semantics<arbitrary>], iteration_bounds = array<i64: 1, 1>, scalar_prefetch = 0 : i64, scratch_operands = 0 : i64, tpu.core_type = #tpu.core_type<tc>, window_params = [{transform_indices = @transform_0, window_bounds = array<i64: 256, 256>}, {transform_indices = @transform_1, window_bounds = array<i64: 256, 256>}, {transform_indices = @transform_2, window_bounds = array<i64: 256, 256>}]} {
    %c0 = arith.constant 0 : index
    %c0_0 = arith.constant 0 : index
    %0 = vector.load %arg2[%c0, %c0_0] : memref<256x256xbf16, #tpu.memory_space<vmem>>, vector<256x256xbf16>
    %c0_1 = arith.constant 0 : index
    %c0_2 = arith.constant 0 : index
    %1 = vector.load %arg3[%c0_1, %c0_2] : memref<256x256xbf16, #tpu.memory_space<vmem>>, vector<256x256xbf16>
    %cst = arith.constant dense<0.000000e+00> : vector<256x256xf32>
    %2 = tpu.matmul %0, %1, %cst {dimension_numbers = #tpu.dot_dimension_numbers<[1], [0], [0], [1], [0, 0, 1, 1], [], []>} : vector<256x256xbf16>, vector<256x256xbf16>, vector<256x256xf32> -> vector<256x256xf32>
    %c0_3 = arith.constant 0 : index
    %c0_4 = arith.constant 0 : index
    %3 = vector.load %arg4[%c0_3, %c0_4] : memref<256x256xf32, #tpu.memory_space<vmem>>, vector<256x256xf32>
    tpu.vector_store %arg4[%c0_3, %c0_4], %2 {strides = array<i32>} : memref<256x256xf32, #tpu.memory_space<vmem>>, vector<256x256xf32>,
    return
  }
  func.func @transform_0(%arg0: i32, %arg1: i32) -> (i32, i32) {
    %c0_i32 = arith.constant 0 : i32
    %c0_i32_0 = arith.constant 0 : i32
    return %arg0, %c0_i32 : i32, i32
  }
  func.func @transform_1(%arg0: i32, %arg1: i32) -> (i32, i32) {
    %c0_i32 = arith.constant 0 : i32
    %c0_i32_0 = arith.constant 0 : i32
    return %c0_i32, %arg1 : i32, i32
  }
  func.func @transform_2(%arg0: i32, %arg1: i32) -> (i32, i32) {
    %c0_i32 = arith.constant 0 : i32
    return %arg0, %arg1 : i32, i32
  }
}

</mosaic_0001>

<bundles_post_ra>
// kernel: tpu_custom_call.1
= control target key start
LH: loop header
LB: loop body
LE: loop exit
PB: predicated region body
PF: predicated region fallthrough
CT: control target
= control target key end

     0   :  { %7 = vsyncpa [#allocation3], 0  ;;  %s1304_s0 = inlined_call_operand.hbm [shape: bf16[256,256], index: 0, kind: input, shape index: {}]   ;;  %s1305_s1 = inlined_call_operand.hbm [shape: bf16[256,256], index: 1, kind: input, shape index: {}]   ;;  %s1306_s2 = inlined_call_operand.hbm [shape: f32[256,256], index: 2, kind: output, shape index: {}]  }
   0x1   :  { %8 = vsyncpa [#allocation6], 0 }
   0x2   :  { %9 = vsyncpa [#allocation4], 0  ;;  %s14_s11 = sshll.u32 %s1304_s0, 4  ;;  %s1273_s12 = smov [#allocation2]   ;;  %s15_s11 = int_to_ptr.hbm [resolvable:$true] %s14_s11 }
   0x3   :  { %s16_s13 = sshll.u32 %s1273_s12, 4  ;;  %s27_s16 = sshll.u32 %s1305_s1, 4  ;;  %s17_s13 = int_to_ptr.vmem [resolvable:$true] %s16_s13  ;;  %s28_s16 = int_to_ptr.hbm [resolvable:$true] %s27_s16 }
   0x4   :  { %s1274_s17 = smov 128   ;;  %s1275_s18 = smov 8  }
   0x5   :  { %22 = dma.hbm_to_vmem [thread:$0]  %s15_s11, 4096, %s17_s13, [#allocation3], %s1274_s17, %s1274_s17, %s1275_s18  }
   0x6   :  { %s1276_s19 = smov [#allocation5]  }
   0x7   :  { %s29_s20 = sshll.u32 %s1276_s19, 4  ;;  %s30_s20 = int_to_ptr.vmem [resolvable:$true] %s29_s20 }
   0x8   :  { %35 = dma.hbm_to_vmem [thread:$0]  %s28_s16, 4096, %s30_s20, [#allocation6], %s1274_s17, %s1274_s17, %s1275_s18  }
   0x9   :  { %1267 = dma.done.wait [#allocation3], 4096  }
   0xa   :  { %1268 = vsyncadd [#allocation3], 4294963200 }
   0xb   :  { %1269 = dma.done.wait [#allocation6], 4096  }
   0xc   :  { %1270 = vsyncadd [#allocation6], 4294963200  ;;  %v1054_v0 = vld [vmem:[#allocation5 + $0x70] sm:$0xf]  ;;  %v1171_v1 = vld [vmem:[#allocation5 + $0x74] sm:$0xf0] }
   0xd   :  { %v1118_v2 = vld [vmem:[#allocation5 + $0xf0] sm:$0xf]  ;;  %v1055_v3 = vor.u32 %v1171_v1, %v1054_v0  ;;  %v1187_v4 = vld [vmem:[#allocation5 + $0xf4] sm:$0xf0]  ;;  %v1170_v5 = vld [vmem:[#allocation5 + $0x74] sm:$0xf] }
   0xe   :  { %v1056_v6 = vld [vmem:[#allocation5 + $0x78] sm:$0xf0]  ;;  %v1119_v7 = vor.u32 %v1187_v4, %v1118_v2  ;;  %v1186_v9 = vld [vmem:[#allocation5 + $0xf4] sm:$0xf]  ;;  %v1046_v11 = vld [vmem:[#allocation5 + $0x60] sm:$0xf] }
   0xf   :  { %v1059_v8 = vor.u32 %v1170_v5, %v1056_v6  ;;  %v1120_v10 = vld [vmem:[#allocation5 + $0xf8] sm:$0xf0]  ;;  %428 = vmatpush.bf16.msra.mxu0 %v1055_v3  ;;  %v1169_v13 = vld [vmem:[#allocation5 + $0x64] sm:$0xf0]  ;;  %v1110_v14 = vld [vmem:[#allocation5 + $0xe0] sm:$0xf] }
  0x10   :  { %v1123_v12 = vor.u32 %v1186_v9, %v1120_v10  ;;  %v1185_v15 = vld [vmem:[#allocation5 + $0xe4] sm:$0xf0]  ;;  %517 = vmatpush.bf16.msra.mxu1 %v1119_v7  ;;  %v1047_v16 = vor.u32 %v1169_v13, %v1046_v11  ;;  %v1168_v18 = vld [vmem:[#allocation5 + $0x64] sm:$0xf]  ;;  %v1048_v19 = vld [vmem:[#allocation5 + $0x68] sm:$0xf0] }
  0x11   :  { %606 = vmatpush.bf16.msra.mxu2 %v1059_v8  ;;  %v1111_v17 = vor.u32 %v1185_v15, %v1110_v14  ;;  %v1184_v20 = vld [vmem:[#allocation5 + $0xe4] sm:$0xf]  ;;  %v1051_v21 = vor.u32 %v1168_v18, %v1048_v19  ;;  %v1112_v22 = vld [vmem:[#allocation5 + $0xe8] sm:$0xf0]  ;;  %v1038_v23 = vld [vmem:[#allocation5 + $0x50] sm:$0xf] }
  0x12   :  { %695 = vmatpush.bf16.msra.mxu3 %v1123_v12  ;;  %v1167_v24 = vld [vmem:[#allocation5 + $0x54] sm:$0xf0]  ;;  %v1115_v25 = vor.u32 %v1184_v20, %v1112_v22  ;;  %v1102_v26 = vld [vmem:[#allocation5 + $0xd0] sm:$0xf]  ;;  %v1166_v28 = vld [vmem:[#allocation5 + $0x54] sm:$0xf] }
  0x13   :  { %v1183_v27 = vld [vmem:[#allocation5 + $0xd4] sm:$0xf0]  ;;  %429 = vmatpush.bf16.msra.mxu0 %v1047_v16  ;;  %v1039_v29 = vor.u32 %v1167_v24, %v1038_v23  ;;  %v1040_v30 = vld [vmem:[#allocation5 + $0x58] sm:$0xf0]  ;;  %v1182_v31 = vld [vmem:[#allocation5 + $0xd4] sm:$0xf] }
  0x14   :  { %v1104_v32 = vld [vmem:[#allocation5 + $0xd8] sm:$0xf0]  ;;  %518 = vmatpush.bf16.msra.mxu1 %v1111_v17  ;;  %v1103_v33 = vor.u32 %v1183_v27, %v1102_v26  ;;  %v1043_v34 = vor.u32 %v1166_v28, %v1040_v30  ;;  %v1030_v35 = vld [vmem:[#allocation5 + $0x40] sm:$0xf]  ;;  %v1165_v36 = vld [vmem:[#allocation5 + $0x44] sm:$0xf0] }
  0x15   :  { %607 = vmatpush.bf16.msra.mxu2 %v1051_v21  ;;  %v1094_v37 = vld [vmem:[#allocation5 + $0xc0] sm:$0xf]  ;;  %v1107_v38 = vor.u32 %v1182_v31, %v1104_v32  ;;  %v1181_v39 = vld [vmem:[#allocation5 + $0xc4] sm:$0xf0]  ;;  %v1164_v40 = vld [vmem:[#allocation5 + $0x44] sm:$0xf]  ;;  %v1031_v44 = vor.u32 %v1165_v36, %v1030_v35 }
  0x16   :  { %696 = vmatpush.bf16.msra.mxu3 %v1115_v25  ;;  %v1032_v41 = vld [vmem:[#allocation5 + $0x48] sm:$0xf0]  ;;  %v1180_v42 = vld [vmem:[#allocation5 + $0xc4] sm:$0xf]  ;;  %v1095_v45 = vor.u32 %v1181_v39, %v1094_v37  ;;  %v1022_v47 = vld [vmem:[#allocation5 + $0x30] sm:$0xf] }
  0x17   :  { %v1096_v43 = vld [vmem:[#allocation5 + $0xc8] sm:$0xf0]  ;;  %430 = vmatpush.bf16.msra.mxu0 %v1039_v29  ;;  %v1035_v46 = vor.u32 %v1164_v40, %v1032_v41  ;;  %v1163_v48 = vld [vmem:[#allocation5 + $0x34] sm:$0xf0]  ;;  %v1086_v49 = vld [vmem:[#allocation5 + $0xb0] sm:$0xf] }
  0x18   :  { %519 = vmatpush.bf16.msra.mxu1 %v1103_v33  ;;  %v1099_v50 = vor.u32 %v1180_v42, %v1096_v43  ;;  %v1179_v51 = vld [vmem:[#allocation5 + $0xb4] sm:$0xf0]  ;;  %v1162_v52 = vld [vmem:[#allocation5 + $0x34] sm:$0xf]  ;;  %v1024_v53 = vld [vmem:[#allocation5 + $0x38] sm:$0xf0]  ;;  %v1023_v56 = vor.u32 %v1163_v48, %v1022_v47 }
  0x19   :  { %608 = vmatpush.bf16.msra.mxu2 %v1043_v34  ;;  %v1178_v54 = vld [vmem:[#allocation5 + $0xb4] sm:$0xf]  ;;  %v1088_v55 = vld [vmem:[#allocation5 + $0xb8] sm:$0xf0]  ;;  %v1087_v57 = vor.u32 %v1179_v51, %v1086_v49  ;;  %v1027_v58 = vor.u32 %v1162_v52, %v1024_v53  ;;  %v1014_v59 = vld [vmem:[#allocation5 + $0x20] sm:$0xf] }
  0x1a   :  { %697 = vmatpush.bf16.msra.mxu3 %v1107_v38  ;;  %v1161_v60 = vld [vmem:[#allocation5 + $0x24] sm:$0xf0]  ;;  %v1078_v61 = vld [vmem:[#allocation5 + $0xa0] sm:$0xf]  ;;  %v1091_v62 = vor.u32 %v1178_v54, %v1088_v55  ;;  %v1160_v0 = vld [vmem:[#allocation5 + $0x24] sm:$0xf] }
  0x1b   :  { %431 = vmatpush.bf16.msra.mxu0 %v1031_v44  ;;  %v1177_v63 = vld [vmem:[#allocation5 + $0xa4] sm:$0xf0]  ;;  %v1016_v1 = vld [vmem:[#allocation5 + $0x28] sm:$0xf0]  ;;  %v1176_v2 = vld [vmem:[#allocation5 + $0xa4] sm:$0xf]  ;;  %v1015_v4 = vor.u32 %v1161_v60, %v1014_v59 }
  0x1c   :  { %520 = vmatpush.bf16.msra.mxu1 %v1095_v45  ;;  %v1080_v3 = vld [vmem:[#allocation5 + $0xa8] sm:$0xf0]  ;;  %v1079_v5 = vor.u32 %v1177_v63, %v1078_v61  ;;  %v1019_v6 = vor.u32 %v1160_v0, %v1016_v1  ;;  %v1006_v7 = vld [vmem:[#allocation5 + $0x10] sm:$0xf]  ;;  %v1159_v8 = vld [vmem:[#allocation5 + $0x14] sm:$0xf0] }
  0x1d   :  { %609 = vmatpush.bf16.msra.mxu2 %v1035_v46  ;;  %v1070_v9 = vld [vmem:[#allocation5 + $0x90] sm:$0xf]  ;;  %v1083_v10 = vor.u32 %v1176_v2, %v1080_v3  ;;  %v1175_v11 = vld [vmem:[#allocation5 + $0x94] sm:$0xf0]  ;;  %v1158_v12 = vld [vmem:[#allocation5 + $0x14] sm:$0xf]  ;;  %v1007_v16 = vor.u32 %v1159_v8, %v1006_v7 }
  0x1e   :  { %698 = vmatpush.bf16.msra.mxu3 %v1099_v50  ;;  %v1008_v13 = vld [vmem:[#allocation5 + $0x18] sm:$0xf0]  ;;  %v1174_v14 = vld [vmem:[#allocation5 + $0x94] sm:$0xf]  ;;  %v1071_v17 = vor.u32 %v1175_v11, %v1070_v9  ;;  %v998_v19 = vld [vmem:[#allocation5] sm:$0xf] }
  0x1f   :  { %432 = vmatpush.bf16.msra.mxu0 %v1023_v56  ;;  %v1072_v15 = vld [vmem:[#allocation5 + $0x98] sm:$0xf0]  ;;  %v1011_v18 = vor.u32 %v1158_v12, %v1008_v13  ;;  %v1157_v20 = vld [vmem:[#allocation5 + $0x4] sm:$0xf0]  ;;  %v1062_v21 = vld [vmem:[#allocation5 + $0x80] sm:$0xf] }
  0x20   :  { %521 = vmatpush.bf16.msra.mxu1 %v1087_v57  ;;  %v1075_v22 = vor.u32 %v1174_v14, %v1072_v15  ;;  %v1173_v23 = vld [vmem:[#allocation5 + $0x84] sm:$0xf0]  ;;  %v1156_v24 = vld [vmem:[#allocation5 + $0x4] sm:$0xf]  ;;  %v1000_v25 = vld [vmem:[#allocation5 + $0x8] sm:$0xf0]  ;;  %v999_v28 = vor.u32 %v1157_v20, %v998_v19 }
  0x21   :  { %610 = vmatpush.bf16.msra.mxu2 %v1027_v58  ;;  %v1172_v26 = vld [vmem:[#allocation5 + $0x84] sm:$0xf]  ;;  %v1064_v27 = vld [vmem:[#allocation5 + $0x88] sm:$0xf0]  ;;  %v870_v29 = vld [vmem:[#allocation2] sm:$0xf]  ;;  %v1063_v31 = vor.u32 %v1173_v23, %v1062_v21  ;;  %v1003_v32 = vor.u32 %v1156_v24, %v1000_v25 }
  0x22   :  { %699 = vmatpush.bf16.msra.mxu3 %v1091_v62  ;;  %v1125_v30 = vld [vmem:[#allocation2 + $0x4] sm:$0xf0]  ;;  %v1124_v33 = vld [vmem:[#allocation2 + $0x4] sm:$0xf]  ;;  %v872_v34 = vld [vmem:[#allocation2 + $0x8] sm:$0xf0]  ;;  %v1067_v35 = vor.u32 %v1172_v26, %v1064_v27 }
  0x23   :  { %433 = vmatpush.bf16.msra.mxu0 %v1015_v4  ;;  %v871_v36 = vor.u32 %v1125_v30, %v870_v29  ;;  %v875_v37 = vor.u32 %v1124_v33, %v872_v34  ;;  %v878_v38 = vld [vmem:[#allocation2 + $0x10] sm:$0xf]  ;;  %v1127_v39 = vld [vmem:[#allocation2 + $0x14] sm:$0xf0]  ;;  %v1126_v40 = vld [vmem:[#allocation2 + $0x14] sm:$0xf] }
  0x24   :  { %522 = vmatpush.bf16.msra.mxu1 %v1079_v5  ;;  %v880_v41 = vld [vmem:[#allocation2 + $0x18] sm:$0xf0]  ;;  %v879_v42 = vor.u32 %v1127_v39, %v878_v38  ;;  %v886_v44 = vld [vmem:[#allocation2 + $0x20] sm:$0xf]  ;;  %v1129_v45 = vld [vmem:[#allocation2 + $0x24] sm:$0xf0] }
  0x25   :  { %611 = vmatpush.bf16.msra.mxu2 %v1019_v6  ;;  %v883_v43 = vor.u32 %v1126_v40, %v880_v41  ;;  %v1128_v46 = vld [vmem:[#allocation2 + $0x24] sm:$0xf]  ;;  %v888_v47 = vld [vmem:[#allocation2 + $0x28] sm:$0xf0]  ;;  %v887_v48 = vor.u32 %v1129_v45, %v886_v44  ;;  %v894_v50 = vld [vmem:[#allocation2 + $0x30] sm:$0xf] }
  0x26   :  { %700 = vmatpush.bf16.msra.mxu3 %v1083_v10  ;;  %v891_v49 = vor.u32 %v1128_v46, %v888_v47  ;;  %v1131_v51 = vld [vmem:[#allocation2 + $0x34] sm:$0xf0]  ;;  %v1130_v52 = vld [vmem:[#allocation2 + $0x34] sm:$0xf]  ;;  %v896_v53 = vld [vmem:[#allocation2 + $0x38] sm:$0xf0] }
  0x27   :  { %434 = vmatpush.bf16.msra.mxu0 %v1007_v16  ;;  %v895_v54 = vor.u32 %v1131_v51, %v894_v50  ;;  %v899_v55 = vor.u32 %v1130_v52, %v896_v53  ;;  %v902_v56 = vld [vmem:[#allocation2 + $0x40] sm:$0xf]  ;;  %v1133_v57 = vld [vmem:[#allocation2 + $0x44] sm:$0xf0]  ;;  %v1132_v58 = vld [vmem:[#allocation2 + $0x44] sm:$0xf] }
  0x28   :  { %523 = vmatpush.bf16.msra.mxu1 %v1071_v17  ;;  %v904_v59 = vld [vmem:[#allocation2 + $0x48] sm:$0xf0]  ;;  %v903_v60 = vor.u32 %v1133_v57, %v902_v56  ;;  %v910_v62 = vld [vmem:[#allocation2 + $0x50] sm:$0xf]  ;;  %v1135_v63 = vld [vmem:[#allocation2 + $0x54] sm:$0xf0] }
  0x29   :  { %612 = vmatpush.bf16.msra.mxu2 %v1011_v18  ;;  %v907_v61 = vor.u32 %v1132_v58, %v904_v59  ;;  %v1134_v0 = vld [vmem:[#allocation2 + $0x54] sm:$0xf]  ;;  %v912_v1 = vld [vmem:[#allocation2 + $0x58] sm:$0xf0]  ;;  %v911_v2 = vor.u32 %v1135_v63, %v910_v62  ;;  %v918_v4 = vld [vmem:[#allocation2 + $0x60] sm:$0xf] }
  0x2a   :  { %701 = vmatpush.bf16.msra.mxu3 %v1075_v22  ;;  %v915_v3 = vor.u32 %v1134_v0, %v912_v1  ;;  %v1137_v5 = vld [vmem:[#allocation2 + $0x64] sm:$0xf0]  ;;  %v1136_v6 = vld [vmem:[#allocation2 + $0x64] sm:$0xf]  ;;  %v920_v7 = vld [vmem:[#allocation2 + $0x68] sm:$0xf0] }
  0x2b   :  { %435 = vmatpush.bf16.msra.mxu0 %v999_v28  ;;  %v919_v8 = vor.u32 %v1137_v5, %v918_v4  ;;  %v923_v9 = vor.u32 %v1136_v6, %v920_v7  ;;  %v926_v10 = vld [vmem:[#allocation2 + $0x70] sm:$0xf]  ;;  %v1139_v11 = vld [vmem:[#allocation2 + $0x74] sm:$0xf0]  ;;  %v1138_v12 = vld [vmem:[#allocation2 + $0x74] sm:$0xf] }
  0x2c   :  { %524 = vmatpush.bf16.msra.mxu1 %v1063_v31  ;;  %v928_v13 = vld [vmem:[#allocation2 + $0x78] sm:$0xf0]  ;;  %v927_v14 = vor.u32 %v1139_v11, %v926_v10  ;;  %v934_v16 = vld [vmem:[#allocation2 + $0x80] sm:$0xf]  ;;  %v1141_v17 = vld [vmem:[#allocation2 + $0x84] sm:$0xf0] }
  0x2d   :  { %613 = vmatpush.bf16.msra.mxu2 %v1003_v32  ;;  %v931_v15 = vor.u32 %v1138_v12, %v928_v13  ;;  %v1140_v18 = vld [vmem:[#allocation2 + $0x84] sm:$0xf]  ;;  %v936_v19 = vld [vmem:[#allocation2 + $0x88] sm:$0xf0]  ;;  %v935_v20 = vor.u32 %v1141_v17, %v934_v16  ;;  %v942_v31 = vld [vmem:[#allocation2 + $0x90] sm:$0xf] }
  0x2e   :  { %702 = vmatpush.bf16.msra.mxu3 %v1067_v35  ;;  %436 = vmatmul.bf16.vlgmr.msra.gmra.mxu0 %v871_v36  ;;  %v939_v22 = vor.u32 %v1140_v18, %v936_v19  ;;  %v1143_v32 = vld [vmem:[#allocation2 + $0x94] sm:$0xf0]  ;;  %v1142_v33 = vld [vmem:[#allocation2 + $0x94] sm:$0xf]  ;;  %v944_v34 = vld [vmem:[#allocation2 + $0x98] sm:$0xf0] }
  0x2f   :  { %525 = vmatmul.bf16.vlgmr.msra.gmra.mxu1 %v875_v37  ;;  %v947_v39 = vor.u32 %v1142_v33, %v944_v34  ;;  %v1145_v50 = vld [vmem:[#allocation2 + $0xa4] sm:$0xf0]  ;;  %v1144_v51 = vld [vmem:[#allocation2 + $0xa4] sm:$0xf]  ;;  %v952_v52 = vld [vmem:[#allocation2 + $0xa8] sm:$0xf0] }
  0x30   :  { %614 = vmatmul.bf16.vlgmr.msra.gmra.mxu2 %v871_v36  ;;  %v943_v36 = vor.u32 %v1143_v32, %v942_v31  ;;  %v955_v57 = vor.u32 %v1144_v51, %v952_v52  ;;  %v1147_v4 = vld [vmem:[#allocation2 + $0xb4] sm:$0xf0]  ;;  %v1146_v5 = vld [vmem:[#allocation2 + $0xb4] sm:$0xf]  ;;  %v960_v6 = vld [vmem:[#allocation2 + $0xb8] sm:$0xf0] }
  0x31   :  { %703 = vmatmul.bf16.vlgmr.msra.gmra.mxu3 %v875_v37  ;;  %v963_v11 = vor.u32 %v1146_v5, %v960_v6  ;;  %s1277_s0 = smov [#allocation7]   ;;  %s854_s23 = sshll.u32 %s1306_s2, 4  ;;  %s855_s23 = int_to_ptr.hbm [resolvable:$true] %s854_s23 }
  0x32   :  { %s852_s1 = sshll.u32 %s1277_s0, 4  ;;  %s1278_s24 = smov 256   ;;  %s853_s1 = int_to_ptr.vmem [resolvable:$true] %s852_s1 }
  0x33   :  { %s1279_s25 = smov 16  }
  0x3e   :  { %441 = vmatmul.bf16.gmra.mxu0 %v879_v42 }
  0x3f   :  { %530 = vmatmul.bf16.gmra.mxu1 %v883_v43 }
  0x40   :  { %619 = vmatmul.bf16.gmra.mxu2 %v879_v42 }
  0x41   :  { %708 = vmatmul.bf16.gmra.mxu3 %v883_v43 }
  0x4e   :  { %446 = vmatmul.bf16.gmra.mxu0 %v887_v48 }
  0x4f   :  { %535 = vmatmul.bf16.gmra.mxu1 %v891_v49 }
  0x50   :  { %624 = vmatmul.bf16.gmra.mxu2 %v887_v48 }
  0x51   :  { %713 = vmatmul.bf16.gmra.mxu3 %v891_v49  ;;  %v950_v49 = vld [vmem:[#allocation2 + $0xa0] sm:$0xf] }
  0x5e   :  { %451 = vmatmul.bf16.gmra.mxu0 %v895_v54 }
  0x5f   :  { %540 = vmatmul.bf16.gmra.mxu1 %v899_v55 }
  0x60   :  { %629 = vmatmul.bf16.gmra.mxu2 %v895_v54  ;;  %v951_v54 = vor.u32 %v1145_v50, %v950_v49 }
  0x61   :  { %718 = vmatmul.bf16.gmra.mxu3 %v899_v55 }
  0x6e   :  { %456 = vmatmul.bf16.gmra.mxu0 %v903_v60 }
  0x6f   :  { %545 = vmatmul.bf16.gmra.mxu1 %v907_v61 }
  0x70   :  { %634 = vmatmul.bf16.gmra.mxu2 %v903_v60 }
  0x71   :  { %723 = vmatmul.bf16.gmra.mxu3 %v907_v61 }
  0x7e   :  { %461 = vmatmul.bf16.gmra.mxu0 %v911_v2 }
  0x7f   :  { %550 = vmatmul.bf16.gmra.mxu1 %v915_v3 }
  0x80   :  { %639 = vmatmul.bf16.gmra.mxu2 %v911_v2 }
  0x81   :  { %728 = vmatmul.bf16.gmra.mxu3 %v915_v3  ;;  %v958_v3 = vld [vmem:[#allocation2 + $0xb0] sm:$0xf] }
  0x8e   :  { %466 = vmatmul.bf16.gmra.mxu0 %v919_v8 }
  0x8f   :  { %555 = vmatmul.bf16.gmra.mxu1 %v923_v9 }
  0x90   :  { %644 = vmatmul.bf16.gmra.mxu2 %v919_v8  ;;  %v959_v8 = vor.u32 %v1147_v4, %v958_v3 }
  0x91   :  { %733 = vmatmul.bf16.gmra.mxu3 %v923_v9 }
  0x9e   :  { %471 = vmatmul.bf16.gmra.mxu0 %v927_v14 }
  0x9f   :  { %560 = vmatmul.bf16.gmra.mxu1 %v931_v15 }
  0xa0   :  { %649 = vmatmul.bf16.gmra.mxu2 %v927_v14 }
  0xa1   :  { %738 = vmatmul.bf16.gmra.mxu3 %v931_v15 }
  0xab   :  { %v437_v21 = vpop.f32.mrf.mxu0 }
  0xac   :  { %v526_v23 = vpop.f32.mrf.mxu1 }
  0xad   :  { %v527_v24 = vadd.f32 %v526_v23, %v437_v21  ;;  %v966_v21 = vld [vmem:[#allocation2 + $0xc0] sm:$0xf]  ;;  %v1148_v23 = vld [vmem:[#allocation2 + $0xc4] sm:$0xf] }
  0xae   :  { %476 = vmatmul.bf16.gmra.mxu0 %v935_v20 }
  0xaf   :  { %784 = vst [vmem:[#allocation7] sm:$0xff] %v527_v24  ;;  %565 = vmatmul.bf16.gmra.mxu1 %v939_v22  ;;  %v968_v24 = vld [vmem:[#allocation2 + $0xc8] sm:$0xf0] }
  0xb0   :  { %654 = vmatmul.bf16.gmra.mxu2 %v935_v20 }
  0xb1   :  { %743 = vmatmul.bf16.gmra.mxu3 %v939_v22  ;;  %v1149_v22 = vld [vmem:[#allocation2 + $0xc4] sm:$0xf0] }
  0xb3   :  { %v615_v25 = vpop.f32.mrf.mxu2  ;;  %v439_v27 = vpop.f32.mrf.mxu0 }
  0xb4   :  { %v704_v26 = vpop.f32.mrf.mxu3  ;;  %v528_v29 = vpop.f32.mrf.mxu1 }
  0xb5   :  { %v705_v28 = vadd.f32 %v704_v26, %v615_v25  ;;  %v529_v30 = vadd.f32 %v528_v29, %v439_v27  ;;  %v967_v26 = vor.u32 %v1149_v22, %v966_v21  ;;  %v971_v29 = vor.u32 %v1148_v23, %v968_v24 }
  0xb7   :  { %785 = vst [vmem:[#allocation7 + $0x8] sm:$0xff] %v705_v28 }
  0xb8   :  { %786 = vst [vmem:[#allocation7 + $0x10] sm:$0xff] %v529_v30 }
  0xbb   :  { %v617_v35 = vpop.f32.mrf.mxu2  ;;  %v442_v38 = vpop.f32.mrf.mxu0 }
  0xbc   :  { %v706_v37 = vpop.f32.mrf.mxu3  ;;  %v531_v41 = vpop.f32.mrf.mxu1 }
  0xbd   :  { %v707_v40 = vadd.f32 %v706_v37, %v617_v35  ;;  %v532_v42 = vadd.f32 %v531_v41, %v442_v38  ;;  %v1150_v41 = vld [vmem:[#allocation2 + $0xd4] sm:$0xf] }
  0xbe   :  { %481 = vmatmul.bf16.gmra.mxu0 %v943_v36 }
  0xbf   :  { %787 = vst [vmem:[#allocation7 + $0x18] sm:$0xff] %v707_v40  ;;  %570 = vmatmul.bf16.gmra.mxu1 %v947_v39  ;;  %v1151_v40 = vld [vmem:[#allocation2 + $0xd4] sm:$0xf0] }
  0xc0   :  { %788 = vst [vmem:[#allocation7 + $0x20] sm:$0xff] %v532_v42  ;;  %659 = vmatmul.bf16.gmra.mxu2 %v943_v36  ;;  %v976_v42 = vld [vmem:[#allocation2 + $0xd8] sm:$0xf0] }
  0xc1   :  { %748 = vmatmul.bf16.gmra.mxu3 %v947_v39  ;;  %v974_v39 = vld [vmem:[#allocation2 + $0xd0] sm:$0xf] }
  0xc3   :  { %v620_v43 = vpop.f32.mrf.mxu2  ;;  %v444_v45 = vpop.f32.mrf.mxu0 }
  0xc4   :  { %v709_v44 = vpop.f32.mrf.mxu3  ;;  %v533_v47 = vpop.f32.mrf.mxu1 }
  0xc5   :  { %v710_v46 = vadd.f32 %v709_v44, %v620_v43  ;;  %v534_v48 = vadd.f32 %v533_v47, %v444_v45  ;;  %v975_v44 = vor.u32 %v1151_v40, %v974_v39  ;;  %v979_v47 = vor.u32 %v1150_v41, %v976_v42 }
  0xc7   :  { %789 = vst [vmem:[#allocation7 + $0x28] sm:$0xff] %v710_v46 }
  0xc8   :  { %790 = vst [vmem:[#allocation7 + $0x30] sm:$0xff] %v534_v48 }
  0xcb   :  { %v622_v53 = vpop.f32.mrf.mxu2  ;;  %v447_v56 = vpop.f32.mrf.mxu0 }
  0xcc   :  { %v711_v55 = vpop.f32.mrf.mxu3  ;;  %v536_v59 = vpop.f32.mrf.mxu1 }
  0xcd   :  { %v712_v58 = vadd.f32 %v711_v55, %v622_v53  ;;  %v537_v60 = vadd.f32 %v536_v59, %v447_v56  ;;  %v1152_v59 = vld [vmem:[#allocation2 + $0xe4] sm:$0xf] }
  0xce   :  { %486 = vmatmul.bf16.gmra.mxu0 %v951_v54 }
  0xcf   :  { %791 = vst [vmem:[#allocation7 + $0x38] sm:$0xff] %v712_v58  ;;  %575 = vmatmul.bf16.gmra.mxu1 %v955_v57  ;;  %v1153_v58 = vld [vmem:[#allocation2 + $0xe4] sm:$0xf0] }
  0xd0   :  { %792 = vst [vmem:[#allocation7 + $0x40] sm:$0xff] %v537_v60  ;;  %664 = vmatmul.bf16.gmra.mxu2 %v951_v54  ;;  %v984_v60 = vld [vmem:[#allocation2 + $0xe8] sm:$0xf0] }
  0xd1   :  { %753 = vmatmul.bf16.gmra.mxu3 %v955_v57  ;;  %v982_v57 = vld [vmem:[#allocation2 + $0xe0] sm:$0xf] }
  0xd3   :  { %v625_v61 = vpop.f32.mrf.mxu2  ;;  %v449_v63 = vpop.f32.mrf.mxu0 }
  0xd4   :  { %v714_v62 = vpop.f32.mrf.mxu3  ;;  %v538_v1 = vpop.f32.mrf.mxu1 }
  0xd5   :  { %v715_v0 = vadd.f32 %v714_v62, %v625_v61  ;;  %v539_v2 = vadd.f32 %v538_v1, %v449_v63  ;;  %v983_v62 = vor.u32 %v1153_v58, %v982_v57  ;;  %v987_v1 = vor.u32 %v1152_v59, %v984_v60 }
  0xd7   :  { %793 = vst [vmem:[#allocation7 + $0x48] sm:$0xff] %v715_v0 }
  0xd8   :  { %794 = vst [vmem:[#allocation7 + $0x50] sm:$0xff] %v539_v2 }
  0xdb   :  { %v627_v7 = vpop.f32.mrf.mxu2  ;;  %v452_v10 = vpop.f32.mrf.mxu0 }
  0xdc   :  { %v716_v9 = vpop.f32.mrf.mxu3  ;;  %v541_v13 = vpop.f32.mrf.mxu1 }
  0xdd   :  { %v717_v12 = vadd.f32 %v716_v9, %v627_v7  ;;  %v542_v14 = vadd.f32 %v541_v13, %v452_v10  ;;  %v1154_v13 = vld [vmem:[#allocation2 + $0xf4] sm:$0xf] }
  0xde   :  { %491 = vmatmul.bf16.gmra.mxu0 %v959_v8 }
  0xdf   :  { %795 = vst [vmem:[#allocation7 + $0x58] sm:$0xff] %v717_v12  ;;  %580 = vmatmul.bf16.gmra.mxu1 %v963_v11  ;;  %v1155_v12 = vld [vmem:[#allocation2 + $0xf4] sm:$0xf0] }
  0xe0   :  { %796 = vst [vmem:[#allocation7 + $0x60] sm:$0xff] %v542_v14  ;;  %669 = vmatmul.bf16.gmra.mxu2 %v959_v8  ;;  %v992_v14 = vld [vmem:[#allocation2 + $0xf8] sm:$0xf0] }
  0xe1   :  { %758 = vmatmul.bf16.gmra.mxu3 %v963_v11  ;;  %v990_v11 = vld [vmem:[#allocation2 + $0xf0] sm:$0xf] }
  0xe3   :  { %v630_v15 = vpop.f32.mrf.mxu2  ;;  %v454_v17 = vpop.f32.mrf.mxu0 }
  0xe4   :  { %v719_v16 = vpop.f32.mrf.mxu3  ;;  %v543_v19 = vpop.f32.mrf.mxu1 }
  0xe5   :  { %v720_v18 = vadd.f32 %v719_v16, %v630_v15  ;;  %v544_v20 = vadd.f32 %v543_v19, %v454_v17  ;;  %v991_v16 = vor.u32 %v1155_v12, %v990_v11  ;;  %v995_v19 = vor.u32 %v1154_v13, %v992_v14 }
  0xe7   :  { %797 = vst [vmem:[#allocation7 + $0x68] sm:$0xff] %v720_v18 }
  0xe8   :  { %798 = vst [vmem:[#allocation7 + $0x70] sm:$0xff] %v544_v20 }
  0xeb   :  { %v632_v25 = vpop.f32.mrf.mxu2  ;;  %v457_v28 = vpop.f32.mrf.mxu0 }
  0xec   :  { %v721_v27 = vpop.f32.mrf.mxu3  ;;  %v546_v31 = vpop.f32.mrf.mxu1 }
  0xed   :  { %v722_v30 = vadd.f32 %v721_v27, %v632_v25  ;;  %v547_v32 = vadd.f32 %v546_v31, %v457_v28 }
  0xee   :  { %496 = vmatmul.bf16.gmra.mxu0 %v967_v26 }
  0xef   :  { %799 = vst [vmem:[#allocation7 + $0x78] sm:$0xff] %v722_v30  ;;  %585 = vmatmul.bf16.gmra.mxu1 %v971_v29 }
  0xf0   :  { %800 = vst [vmem:[#allocation7 + $0x80] sm:$0xff] %v547_v32  ;;  %674 = vmatmul.bf16.gmra.mxu2 %v967_v26 }
  0xf1   :  { %763 = vmatmul.bf16.gmra.mxu3 %v971_v29 }
  0xf3   :  { %v635_v33 = vpop.f32.mrf.mxu2  ;;  %v459_v35 = vpop.f32.mrf.mxu0 }
  0xf4   :  { %v724_v34 = vpop.f32.mrf.mxu3  ;;  %v548_v37 = vpop.f32.mrf.mxu1 }
  0xf5   :  { %v725_v36 = vadd.f32 %v724_v34, %v635_v33  ;;  %v549_v38 = vadd.f32 %v548_v37, %v459_v35 }
  0xf7   :  { %801 = vst [vmem:[#allocation7 + $0x88] sm:$0xff] %v725_v36 }
  0xf8   :  { %802 = vst [vmem:[#allocation7 + $0x90] sm:$0xff] %v549_v38 }
  0xfb   :  { %v637_v43 = vpop.f32.mrf.mxu2  ;;  %v462_v46 = vpop.f32.mrf.mxu0 }
  0xfc   :  { %v726_v45 = vpop.f32.mrf.mxu3  ;;  %v551_v49 = vpop.f32.mrf.mxu1 }
  0xfd   :  { %v727_v48 = vadd.f32 %v726_v45, %v637_v43  ;;  %v552_v50 = vadd.f32 %v551_v49, %v462_v46 }
  0xfe   :  { %501 = vmatmul.bf16.gmra.mxu0 %v975_v44 }
  0xff   :  { %803 = vst [vmem:[#allocation7 + $0x98] sm:$0xff] %v727_v48  ;;  %590 = vmatmul.bf16.gmra.mxu1 %v979_v47 }
 0x100   :  { %804 = vst [vmem:[#allocation7 + $0xa0] sm:$0xff] %v552_v50  ;;  %679 = vmatmul.bf16.gmra.mxu2 %v975_v44 }
 0x101   :  { %768 = vmatmul.bf16.gmra.mxu3 %v979_v47 }
 0x103   :  { %v640_v51 = vpop.f32.mrf.mxu2  ;;  %v464_v53 = vpop.f32.mrf.mxu0 }
 0x104   :  { %v729_v52 = vpop.f32.mrf.mxu3  ;;  %v553_v55 = vpop.f32.mrf.mxu1 }
 0x105   :  { %v730_v54 = vadd.f32 %v729_v52, %v640_v51  ;;  %v554_v56 = vadd.f32 %v553_v55, %v464_v53 }
 0x107   :  { %805 = vst [vmem:[#allocation7 + $0xa8] sm:$0xff] %v730_v54 }
 0x108   :  { %806 = vst [vmem:[#allocation7 + $0xb0] sm:$0xff] %v554_v56 }
 0x10b   :  { %v642_v61 = vpop.f32.mrf.mxu2  ;;  %v467_v0 = vpop.f32.mrf.mxu0 }
 0x10c   :  { %v731_v63 = vpop.f32.mrf.mxu3  ;;  %v556_v3 = vpop.f32.mrf.mxu1 }
 0x10d   :  { %v732_v2 = vadd.f32 %v731_v63, %v642_v61  ;;  %v557_v4 = vadd.f32 %v556_v3, %v467_v0 }
 0x10e   :  { %506 = vmatmul.bf16.gmra.mxu0 %v983_v62 }
 0x10f   :  { %807 = vst [vmem:[#allocation7 + $0xb8] sm:$0xff] %v732_v2  ;;  %595 = vmatmul.bf16.gmra.mxu1 %v987_v1 }
 0x110   :  { %808 = vst [vmem:[#allocation7 + $0xc0] sm:$0xff] %v557_v4  ;;  %684 = vmatmul.bf16.gmra.mxu2 %v983_v62 }
 0x111   :  { %773 = vmatmul.bf16.gmra.mxu3 %v987_v1 }
 0x113   :  { %v645_v5 = vpop.f32.mrf.mxu2  ;;  %v469_v7 = vpop.f32.mrf.mxu0 }
 0x114   :  { %v734_v6 = vpop.f32.mrf.mxu3  ;;  %v558_v9 = vpop.f32.mrf.mxu1 }
 0x115   :  { %v735_v8 = vadd.f32 %v734_v6, %v645_v5  ;;  %v559_v10 = vadd.f32 %v558_v9, %v469_v7 }
 0x117   :  { %809 = vst [vmem:[#allocation7 + $0xc8] sm:$0xff] %v735_v8 }
 0x118   :  { %810 = vst [vmem:[#allocation7 + $0xd0] sm:$0xff] %v559_v10 }
 0x11b   :  { %v647_v15 = vpop.f32.mrf.mxu2  ;;  %v472_v18 = vpop.f32.mrf.mxu0 }
 0x11c   :  { %v736_v17 = vpop.f32.mrf.mxu3  ;;  %v561_v21 = vpop.f32.mrf.mxu1 }
 0x11d   :  { %v737_v20 = vadd.f32 %v736_v17, %v647_v15  ;;  %v562_v22 = vadd.f32 %v561_v21, %v472_v18 }
 0x11e   :  { %511 = vmatmul.bf16.gmra.mxu0 %v991_v16 }
 0x11f   :  { %811 = vst [vmem:[#allocation7 + $0xd8] sm:$0xff] %v737_v20  ;;  %600 = vmatmul.bf16.gmra.mxu1 %v995_v19 }
 0x120   :  { %812 = vst [vmem:[#allocation7 + $0xe0] sm:$0xff] %v562_v22  ;;  %689 = vmatmul.bf16.gmra.mxu2 %v991_v16 }
 0x121   :  { %778 = vmatmul.bf16.gmra.mxu3 %v995_v19 }
 0x123   :  { %v650_v23 = vpop.f32.mrf.mxu2  ;;  %v474_v25 = vpop.f32.mrf.mxu0 }
 0x124   :  { %v739_v24 = vpop.f32.mrf.mxu3  ;;  %v563_v27 = vpop.f32.mrf.mxu1 }
 0x125   :  { %v740_v26 = vadd.f32 %v739_v24, %v650_v23  ;;  %v564_v28 = vadd.f32 %v563_v27, %v474_v25 }
 0x127   :  { %813 = vst [vmem:[#allocation7 + $0xe8] sm:$0xff] %v740_v26 }
 0x128   :  { %814 = vst [vmem:[#allocation7 + $0xf0] sm:$0xff] %v564_v28 }
 0x12b   :  { %v652_v29 = vpop.f32.mrf.mxu2  ;;  %v477_v31 = vpop.f32.mrf.mxu0 }
 0x12c   :  { %v741_v30 = vpop.f32.mrf.mxu3  ;;  %v566_v33 = vpop.f32.mrf.mxu1 }
 0x12d   :  { %v742_v32 = vadd.f32 %v741_v30, %v652_v29  ;;  %v567_v34 = vadd.f32 %v566_v33, %v477_v31 }
 0x12f   :  { %815 = vst [vmem:[#allocation7 + $0xf8] sm:$0xff] %v742_v32 }
 0x130   :  { %816 = vst [vmem:[#allocation7 + $0x100] sm:$0xff] %v567_v34 }
 0x133   :  { %v655_v35 = vpop.f32.mrf.mxu2  ;;  %v479_v37 = vpop.f32.mrf.mxu0 }
 0x134   :  { %v744_v36 = vpop.f32.mrf.mxu3  ;;  %v568_v39 = vpop.f32.mrf.mxu1 }
 0x135   :  { %v745_v38 = vadd.f32 %v744_v36, %v655_v35  ;;  %v569_v40 = vadd.f32 %v568_v39, %v479_v37 }
 0x137   :  { %817 = vst [vmem:[#allocation7 + $0x108] sm:$0xff] %v745_v38 }
 0x138   :  { %818 = vst [vmem:[#allocation7 + $0x110] sm:$0xff] %v569_v40 }
 0x13b   :  { %v657_v41 = vpop.f32.mrf.mxu2  ;;  %v482_v43 = vpop.f32.mrf.mxu0 }
 0x13c   :  { %v746_v42 = vpop.f32.mrf.mxu3  ;;  %v571_v45 = vpop.f32.mrf.mxu1 }
 0x13d   :  { %v747_v44 = vadd.f32 %v746_v42, %v657_v41  ;;  %v572_v46 = vadd.f32 %v571_v45, %v482_v43 }
 0x13f   :  { %819 = vst [vmem:[#allocation7 + $0x118] sm:$0xff] %v747_v44 }
 0x140   :  { %820 = vst [vmem:[#allocation7 + $0x120] sm:$0xff] %v572_v46 }
 0x143   :  { %v660_v47 = vpop.f32.mrf.mxu2  ;;  %v484_v49 = vpop.f32.mrf.mxu0 }
 0x144   :  { %v749_v48 = vpop.f32.mrf.mxu3  ;;  %v573_v51 = vpop.f32.mrf.mxu1 }
 0x145   :  { %v750_v50 = vadd.f32 %v749_v48, %v660_v47  ;;  %v574_v52 = vadd.f32 %v573_v51, %v484_v49 }
 0x147   :  { %821 = vst [vmem:[#allocation7 + $0x128] sm:$0xff] %v750_v50 }
 0x148   :  { %822 = vst [vmem:[#allocation7 + $0x130] sm:$0xff] %v574_v52 }
 0x14b   :  { %v662_v53 = vpop.f32.mrf.mxu2  ;;  %v487_v55 = vpop.f32.mrf.mxu0 }
 0x14c   :  { %v751_v54 = vpop.f32.mrf.mxu3  ;;  %v576_v57 = vpop.f32.mrf.mxu1 }
 0x14d   :  { %v752_v56 = vadd.f32 %v751_v54, %v662_v53  ;;  %v577_v58 = vadd.f32 %v576_v57, %v487_v55 }
 0x14f   :  { %823 = vst [vmem:[#allocation7 + $0x138] sm:$0xff] %v752_v56 }
 0x150   :  { %824 = vst [vmem:[#allocation7 + $0x140] sm:$0xff] %v577_v58 }
 0x153   :  { %v665_v59 = vpop.f32.mrf.mxu2  ;;  %v489_v61 = vpop.f32.mrf.mxu0 }
 0x154   :  { %v754_v60 = vpop.f32.mrf.mxu3  ;;  %v578_v63 = vpop.f32.mrf.mxu1 }
 0x155   :  { %v755_v62 = vadd.f32 %v754_v60, %v665_v59  ;;  %v579_v0 = vadd.f32 %v578_v63, %v489_v61 }
 0x157   :  { %825 = vst [vmem:[#allocation7 + $0x148] sm:$0xff] %v755_v62 }
 0x158   :  { %826 = vst [vmem:[#allocation7 + $0x150] sm:$0xff] %v579_v0 }
 0x15b   :  { %v667_v1 = vpop.f32.mrf.mxu2  ;;  %v492_v3 = vpop.f32.mrf.mxu0 }
 0x15c   :  { %v756_v2 = vpop.f32.mrf.mxu3  ;;  %v581_v5 = vpop.f32.mrf.mxu1 }
 0x15d   :  { %v757_v4 = vadd.f32 %v756_v2, %v667_v1  ;;  %v582_v6 = vadd.f32 %v581_v5, %v492_v3 }
 0x15f   :  { %827 = vst [vmem:[#allocation7 + $0x158] sm:$0xff] %v757_v4 }
 0x160   :  { %828 = vst [vmem:[#allocation7 + $0x160] sm:$0xff] %v582_v6 }
 0x163   :  { %v670_v7 = vpop.f32.mrf.mxu2  ;;  %v494_v9 = vpop.f32.mrf.mxu0 }
 0x164   :  { %v759_v8 = vpop.f32.mrf.mxu3  ;;  %v583_v11 = vpop.f32.mrf.mxu1 }
 0x165   :  { %v760_v10 = vadd.f32 %v759_v8, %v670_v7  ;;  %v584_v12 = vadd.f32 %v583_v11, %v494_v9 }
 0x167   :  { %829 = vst [vmem:[#allocation7 + $0x168] sm:$0xff] %v760_v10 }
 0x168   :  { %830 = vst [vmem:[#allocation7 + $0x170] sm:$0xff] %v584_v12 }
 0x16b   :  { %v672_v13 = vpop.f32.mrf.mxu2  ;;  %v497_v15 = vpop.f32.mrf.mxu0 }
 0x16c   :  { %v761_v14 = vpop.f32.mrf.mxu3  ;;  %v586_v17 = vpop.f32.mrf.mxu1 }
 0x16d   :  { %v762_v16 = vadd.f32 %v761_v14, %v672_v13  ;;  %v587_v18 = vadd.f32 %v586_v17, %v497_v15 }
 0x16f   :  { %831 = vst [vmem:[#allocation7 + $0x178] sm:$0xff] %v762_v16 }
 0x170   :  { %832 = vst [vmem:[#allocation7 + $0x180] sm:$0xff] %v587_v18 }
 0x173   :  { %v675_v19 = vpop.f32.mrf.mxu2  ;;  %v499_v21 = vpop.f32.mrf.mxu0 }
 0x174   :  { %v764_v20 = vpop.f32.mrf.mxu3  ;;  %v588_v23 = vpop.f32.mrf.mxu1 }
 0x175   :  { %v765_v22 = vadd.f32 %v764_v20, %v675_v19  ;;  %v589_v24 = vadd.f32 %v588_v23, %v499_v21 }
 0x177   :  { %833 = vst [vmem:[#allocation7 + $0x188] sm:$0xff] %v765_v22 }
 0x178   :  { %834 = vst [vmem:[#allocation7 + $0x190] sm:$0xff] %v589_v24 }
 0x17b   :  { %v677_v25 = vpop.f32.mrf.mxu2  ;;  %v502_v27 = vpop.f32.mrf.mxu0 }
 0x17c   :  { %v766_v26 = vpop.f32.mrf.mxu3  ;;  %v591_v29 = vpop.f32.mrf.mxu1 }
 0x17d   :  { %v767_v28 = vadd.f32 %v766_v26, %v677_v25  ;;  %v592_v30 = vadd.f32 %v591_v29, %v502_v27 }
 0x17f   :  { %835 = vst [vmem:[#allocation7 + $0x198] sm:$0xff] %v767_v28 }
 0x180   :  { %836 = vst [vmem:[#allocation7 + $0x1a0] sm:$0xff] %v592_v30 }
 0x183   :  { %v680_v31 = vpop.f32.mrf.mxu2  ;;  %v504_v33 = vpop.f32.mrf.mxu0 }
 0x184   :  { %v769_v32 = vpop.f32.mrf.mxu3  ;;  %v593_v35 = vpop.f32.mrf.mxu1 }
 0x185   :  { %v770_v34 = vadd.f32 %v769_v32, %v680_v31  ;;  %v594_v36 = vadd.f32 %v593_v35, %v504_v33 }
 0x187   :  { %837 = vst [vmem:[#allocation7 + $0x1a8] sm:$0xff] %v770_v34 }
 0x188   :  { %838 = vst [vmem:[#allocation7 + $0x1b0] sm:$0xff] %v594_v36 }
 0x18b   :  { %v682_v37 = vpop.f32.mrf.mxu2  ;;  %v507_v39 = vpop.f32.mrf.mxu0 }
 0x18c   :  { %v771_v38 = vpop.f32.mrf.mxu3  ;;  %v596_v41 = vpop.f32.mrf.mxu1 }
 0x18d   :  { %v772_v40 = vadd.f32 %v771_v38, %v682_v37  ;;  %v597_v42 = vadd.f32 %v596_v41, %v507_v39 }
 0x18f   :  { %839 = vst [vmem:[#allocation7 + $0x1b8] sm:$0xff] %v772_v40 }
 0x190   :  { %840 = vst [vmem:[#allocation7 + $0x1c0] sm:$0xff] %v597_v42 }
 0x193   :  { %v685_v43 = vpop.f32.mrf.mxu2  ;;  %v509_v45 = vpop.f32.mrf.mxu0 }
 0x194   :  { %v774_v44 = vpop.f32.mrf.mxu3  ;;  %v598_v47 = vpop.f32.mrf.mxu1 }
 0x195   :  { %v775_v46 = vadd.f32 %v774_v44, %v685_v43  ;;  %v599_v48 = vadd.f32 %v598_v47, %v509_v45 }
 0x197   :  { %841 = vst [vmem:[#allocation7 + $0x1c8] sm:$0xff] %v775_v46 }
 0x198   :  { %842 = vst [vmem:[#allocation7 + $0x1d0] sm:$0xff] %v599_v48 }
 0x19b   :  { %v687_v49 = vpop.f32.mrf.mxu2  ;;  %v512_v51 = vpop.f32.mrf.mxu0 }
 0x19c   :  { %v776_v50 = vpop.f32.mrf.mxu3  ;;  %v601_v53 = vpop.f32.mrf.mxu1 }
 0x19d   :  { %v777_v52 = vadd.f32 %v776_v50, %v687_v49  ;;  %v602_v54 = vadd.f32 %v601_v53, %v512_v51 }
 0x19f   :  { %843 = vst [vmem:[#allocation7 + $0x1d8] sm:$0xff] %v777_v52 }
 0x1a0   :  { %844 = vst [vmem:[#allocation7 + $0x1e0] sm:$0xff] %v602_v54 }
 0x1a3   :  { %v690_v55 = vpop.f32.mrf.mxu2  ;;  %v514_v57 = vpop.f32.mrf.mxu0 }
 0x1a4   :  { %v779_v56 = vpop.f32.mrf.mxu3  ;;  %v603_v59 = vpop.f32.mrf.mxu1 }
 0x1a5   :  { %v780_v58 = vadd.f32 %v779_v56, %v690_v55  ;;  %v604_v60 = vadd.f32 %v603_v59, %v514_v57 }
 0x1a7   :  { %845 = vst [vmem:[#allocation7 + $0x1e8] sm:$0xff] %v780_v58 }
 0x1a8   :  { %846 = vst [vmem:[#allocation7 + $0x1f0] sm:$0xff] %v604_v60 }
 0x1ab   :  { %v692_v61 = vpop.f32.mrf.mxu2 }
 0x1ac   :  { %v781_v62 = vpop.f32.mrf.mxu3 }
 0x1ad   :  { %v782_v63 = vadd.f32 %v781_v62, %v692_v61 }
 0x1af   :  { %847 = vst [vmem:[#allocation7 + $0x1f8] sm:$0xff] %v782_v63 }
 0x1b0   :  { %860 = dma.vmem_to_hbm [thread:$0]  %s853_s1, 8192, %s855_s23, [#allocation4], %s1278_s24, %s1278_s24, %s1279_s25  }
 0x1b1   :  { %1271 = dma.done.wait [#allocation4], 8192  }
 0x1b2   :  { %1272 = vsyncadd [#allocation4], 4294959104 }
 0x1b3   :  { %865 = vsyncpa [#allocation3], 1 }
 0x1b4   :  { %866 = vsyncpa [#allocation6], 1 }
 0x1b5   :  { %867 = vsyncpa [#allocation4], 1 }

</bundles_post_ra>
